<compile_context>
chip_gen: v7x
topology: tpu7x:2x2x1
jax: 0.10.0
libtpu: 0.0.40
codegen_flags: <defaults>
</compile_context>

<pallas_src>
import math

import jax
import jax.numpy as jnp
from jax import lax
from jax.experimental import pallas as pl
from jax.experimental.pallas import tpu as pltpu


_LANE = 128
_TARGET_BLOCK_BYTES = 1 << 20  # ~1 MiB f32 per grid step


def _rand_uniform_kernel(seed_ref, out_ref):
    """Fill out_ref with uniform [0, 1) f32 from a stateless counter hash."""
    blk_rows, width = out_ref.shape
    base_row = pl.program_id(0) * blk_rows

    row = lax.broadcasted_iota(jnp.int32, (blk_rows, width), 0)
    col = lax.broadcasted_iota(jnp.int32, (blk_rows, width), 1)
    # Global flat element index, offset by a seed-dependent constant.
    # int32 wraparound is harmless: the hash only needs distinct inputs.
    ctr = (base_row + row) * width + col + seed_ref[0] * jnp.int32(1000003)

    x = lax.bitcast_convert_type(ctr, jnp.uint32)
    # splitmix32-style stateless mix + finalizer (good avalanche, VPU-only).
    x = x * jnp.uint32(0x9E3779B9) + jnp.uint32(1)
    x = (x ^ (x >> jnp.uint32(16))) * jnp.uint32(0x7FEB352D)
    x = (x ^ (x >> jnp.uint32(15))) * jnp.uint32(0x846CA68B)
    x = x ^ (x >> jnp.uint32(16))

    # 23 random mantissa bits, exponent 127  ->  float in [1, 2); subtract 1.
    fbits = (x >> jnp.uint32(9)) | jnp.uint32(0x3F800000)
    out_ref[...] = lax.bitcast_convert_type(fbits, jnp.float32) - jnp.float32(1.0)


def _plan_slab(total: int):
    """Pick a lane-dense (rows, width) slab; avoid padding when possible."""
    for width in (1024, 512, 256, 128):
        if total % width == 0:
            return total // width, width
    # Fallback: total not a multiple of 128 -> pad, slice afterwards.
    return pl.cdiv(total, _LANE), _LANE


def _generate_uniform(total: int, seed: int) -> jnp.ndarray:
    """Return `total` uniform [0,1) float32 values (flat)."""
    rows, width = _plan_slab(total)
    padded = rows * width

    target_rows = max(8, (_TARGET_BLOCK_BYTES // (width * 4)) // 8 * 8)
    if rows <= target_rows:
        blk_rows = rows          # single block == full array dim (always legal)
    else:
        blk_rows = target_rows   # multiple of 8; boundary block handled by Pallas
    grid = pl.cdiv(rows, blk_rows)

    seed_arr = jnp.asarray([seed], dtype=jnp.int32)
    slab = pl.pallas_call(
        _rand_uniform_kernel,
        out_shape=jax.ShapeDtypeStruct((rows, width), jnp.float32),
        grid_spec=pltpu.PrefetchScalarGridSpec(
            num_scalar_prefetch=1,
            grid=(grid,),
            in_specs=[],
            out_specs=pl.BlockSpec((blk_rows, width), lambda i, seed: (i, 0)),
        ),
        compiler_params=pltpu.CompilerParams(
            dimension_semantics=("parallel",),
        ),
    )(seed_arr)

    flat = slab.reshape(-1)
    if padded != total:
        flat = flat[:total]
    return flat


class RandomFeatGenerator:
    """JAX/Pallas port of the PyTorch RandomFeatGenerator."""

    def __init__(self, down_factor: int, dim: int):
        self.df = down_factor
        self.dim = dim
        # Mirror of the unused nn.Linear(2, 3) "dummy" parameters.  They do
        # not participate in forward (kept only for module fidelity).
        k = jax.random.PRNGKey(42)
        kw, kb = jax.random.split(k)
        bound = 1.0 / math.sqrt(2.0)
        self.dummy_w = jax.random.uniform(kw, (3, 2), jnp.float32, -bound, bound)
        self.dummy_b = jax.random.uniform(kb, (3,), jnp.float32, -bound, bound)

    def __call__(self, x: jnp.ndarray, seed: int = 0) -> jnp.ndarray:
        if x.ndim == 4:
            N, C, H, W = x.shape
            out_shape = (N, self.dim, round(H / self.df), round(W / self.df))
        elif x.ndim == 5:
            N, C, T, H, W = x.shape
            out_shape = (N, self.dim, T, round(H / self.df), round(W / self.df))
        else:
            raise ValueError("input must be 4-D (NCHW) or 5-D (NCTHW)")
        # TODO(synk): torch.rand consumes the global CUDA RNG state; here the
        # stream is selected by the explicit `seed` argument instead.
        total = math.prod(out_shape)
        return _generate_uniform(total, seed).reshape(out_shape)

    def __str__(self):
        return ""


if __name__ == "__main__":
    key = jax.random.PRNGKey(0)
    # Small shapes consistent with the module: x is NCHW (values are ignored).
    x = jax.random.normal(key, (2, 4, 16, 16), dtype=jnp.float32)

    gen = RandomFeatGenerator(down_factor=2, dim=8)
    feat = jax.block_until_ready(gen(x, seed=0))

    # Shape / dtype / range of uniform [0, 1).
    assert feat.shape == (2, 8, 8, 8), feat.shape
    assert feat.dtype == jnp.float32, feat.dtype
    assert bool(jnp.all(feat >= 0.0)) and bool(jnp.all(feat < 1.0))
    # Reasonable uniform statistics and not a constant tensor.
    assert 0.35 < float(feat.mean()) < 0.65, float(feat.mean())
    assert float(feat.std()) > 0.2, float(feat.std())
    # Deterministic per seed, different across seeds.
    feat_again = jax.block_until_ready(gen(x, seed=0))
    assert bool(jnp.all(feat == feat_again))
    feat_s1 = jax.block_until_ready(gen(x, seed=1))
    assert not bool(jnp.all(feat == feat_s1))

    # 5-D path (NCTHW).
    x5 = jax.random.normal(key, (2, 4, 3, 16, 16), dtype=jnp.float32)
    feat5 = jax.block_until_ready(gen(x5, seed=2))
    assert feat5.shape == (2, 8, 3, 8, 8), feat5.shape
    assert bool(jnp.all(feat5 >= 0.0)) and bool(jnp.all(feat5 < 1.0))

    print("KERNEL_OK")
</pallas_src>

<mosaic_0001>
module attributes {stable_mosaic.version = 11 : i64} {
  func.func @_rand_uniform_kernel(%arg0: i32, %arg1: memref<1xi32, #tpu.memory_space<smem>>, %arg2: memref<1x1024xf32, #tpu.memory_space<vmem>>) attributes {dimension_semantics = [#tpu.dimension_semantics<parallel>], iteration_bounds = array<i64: 1>, scalar_prefetch = 1 : i64, scratch_operands = 0 : i64, tpu.core_type = #tpu.core_type<tc>, window_params = [{transform_indices = @transform_0, window_bounds = array<i64: 1, 1024>}]} {
    %c1_i32 = arith.constant 1 : i32
    %0 = arith.muli %arg0, %c1_i32 : i32
    %1 = tpu.iota {dimensions = array<i32: 0>} : vector<1x1024xi32>
    %2 = tpu.iota {dimensions = array<i32: 1>} : vector<1x1024xi32>
    %3 = vector.broadcast %0 : i32 to vector<1x1024xi32>
    %4 = arith.addi %3, %1 : vector<1x1024xi32>
    %c1024_i32 = arith.constant 1024 : i32
    %5 = vector.broadcast %c1024_i32 : i32 to vector<1x1024xi32>
    %6 = arith.muli %4, %5 : vector<1x1024xi32>
    %7 = arith.addi %6, %2 : vector<1x1024xi32>
    %c0 = arith.constant 0 : index
    %8 = memref.load %arg1[%c0] : memref<1xi32, #tpu.memory_space<smem>>
    %c1000003_i32 = arith.constant 1000003 : i32
    %9 = arith.muli %8, %c1000003_i32 : i32
    %10 = vector.broadcast %9 : i32 to vector<1x1024xi32>
    %11 = arith.addi %7, %10 : vector<1x1024xi32>
    %12 = tpu.bitcast %11 : vector<1x1024xi32> -> vector<1x1024xi32>
    %c-1640531527_i32 = arith.constant -1640531527 : i32
    %13 = vector.broadcast %c-1640531527_i32 : i32 to vector<1x1024xi32>
    %14 = arith.muli %12, %13 : vector<1x1024xi32>
    %c1_i32_0 = arith.constant 1 : i32
    %15 = vector.broadcast %c1_i32_0 : i32 to vector<1x1024xi32>
    %16 = arith.addi %14, %15 : vector<1x1024xi32>
    %c16_i32 = arith.constant 16 : i32
    %17 = vector.broadcast %c16_i32 : i32 to vector<1x1024xi32>
    %18 = arith.shrui %16, %17 : vector<1x1024xi32>
    %19 = arith.xori %16, %18 : vector<1x1024xi32>
    %c2146121005_i32 = arith.constant 2146121005 : i32
    %20 = vector.broadcast %c2146121005_i32 : i32 to vector<1x1024xi32>
    %21 = arith.muli %19, %20 : vector<1x1024xi32>
    %c15_i32 = arith.constant 15 : i32
    %22 = vector.broadcast %c15_i32 : i32 to vector<1x1024xi32>
    %23 = arith.shrui %21, %22 : vector<1x1024xi32>
    %24 = arith.xori %21, %23 : vector<1x1024xi32>
    %c-2073254261_i32 = arith.constant -2073254261 : i32
    %25 = vector.broadcast %c-2073254261_i32 : i32 to vector<1x1024xi32>
    %26 = arith.muli %24, %25 : vector<1x1024xi32>
    %c16_i32_1 = arith.constant 16 : i32
    %27 = vector.broadcast %c16_i32_1 : i32 to vector<1x1024xi32>
    %28 = arith.shrui %26, %27 : vector<1x1024xi32>
    %29 = arith.xori %26, %28 : vector<1x1024xi32>
    %c9_i32 = arith.constant 9 : i32
    %30 = vector.broadcast %c9_i32 : i32 to vector<1x1024xi32>
    %31 = arith.shrui %29, %30 : vector<1x1024xi32>
    %c1065353216_i32 = arith.constant 1065353216 : i32
    %32 = vector.broadcast %c1065353216_i32 : i32 to vector<1x1024xi32>
    %33 = arith.ori %31, %32 : vector<1x1024xi32>
    %34 = tpu.bitcast %33 : vector<1x1024xi32> -> vector<1x1024xf32>
    %cst = arith.constant 1.000000e+00 : f32
    %35 = vector.broadcast %cst : f32 to vector<1x1024xf32>
    %36 = arith.subf %34, %35 : vector<1x1024xf32>
    %c0_2 = arith.constant 0 : index
    %c0_3 = arith.constant 0 : index
    %37 = vector.load %arg2[%c0_2, %c0_3] : memref<1x1024xf32, #tpu.memory_space<vmem>>, vector<1x1024xf32>
    tpu.vector_store %arg2[%c0_2, %c0_3], %36 {strides = array<i32>} : memref<1x1024xf32, #tpu.memory_space<vmem>>, vector<1x1024xf32>,
    return
  }
  func.func @transform_0(%arg0: i32, %arg1: memref<1xi32, #tpu.memory_space<smem>>) -> (i32, i32) {
    %c0_i32 = arith.constant 0 : i32
    %c0_i32_0 = arith.constant 0 : i32
    return %arg0, %c0_i32 : i32, i32
  }
}

</mosaic_0001>

<bundles_post_ra>
// kernel: tpu_custom_call.1
= control target key start
LH: loop header
LB: loop body
LE: loop exit
PB: predicated region body
PF: predicated region fallthrough
CT: control target
= control target key end

     0   :  { %7 = vsyncpa [#allocation5], 0  ;;  %v8_v0 = vlaneseq  ;;  %v260_v3 = vmov 1966171168   ;;  %s295_s0 = inlined_call_operand.<no memory space> [shape: s32[1], index: 0, kind: input, shape index: {}]   ;;  %s296_s1 = inlined_call_operand.hbm [shape: f32[1,1024], index: 1, kind: output, shape index: {}]  }
   0x1   :  { %s31_s8 = smul.u32 1000003, %s295_s0  ;;  %v166_v4 = vunpack.c.l.s4 %v260_v3  ;;  %s261_s0 = smov [#allocation4]  }
   0x2   :  { %v9_v1 = vshrl.u32 %v8_v0, 7  ;;  %v11_v2 = vand.u32 127, %v8_v0  ;;  %s218_s9 = sshll.u32 %s261_s0, 4  ;;  %s219_s9 = int_to_ptr.vmem [resolvable:$true] %s218_s9 }
   0x3   :  { %v32_v13 = vstv %s31_s8  ;;  %v167_v14 = vunpack.c.0.s8 %v166_v4  ;;  %s236_s10 = scalar_lea.vmem %s219_s9, 128  ;;  %p241_p1 = scmp.lt.s32.totalorder %s219_s9, %s219_s9 }
   0x4   :  { %v12_v5 = vadd.s32 128, %v11_v2  ;;  %v13_v6 = vadd.s32 256, %v11_v2  ;;  %v14_v7 = vadd.s32 384, %v11_v2  ;;  %v15_v8 = vadd.s32 512, %v11_v2  ;;  %p237_p0 = scmp.ne.s32.totalorder %s219_s9, %s236_s10  ;;  %p242_p2 = scmp.lt.s32.totalorder %s236_s10, %s236_s10 }
   0x5   :  { %v16_v9 = vadd.s32 640, %v11_v2  ;;  %v17_v10 = vadd.s32 768, %v11_v2  ;;  %v18_v11 = vadd.s32 896, %v11_v2  ;;  %v21_v12 = vmul.u32 1024, %v9_v1 }
   0x6   :  { %v275_v35 = vsub.s32 %v167_v14, %v9_v1  ;;  %p243_p3 = por %p242_p2, %p241_p1 }
   0x7   :  { %v22_v15 = vadd.s32 %v21_v12, %v11_v2  ;;  %v23_v16 = vadd.s32 %v21_v12, %v12_v5  ;;  %v24_v17 = vadd.s32 %v21_v12, %v13_v6  ;;  %v25_v18 = vadd.s32 %v21_v12, %v14_v7 }
   0x8   :  { %v26_v19 = vadd.s32 %v21_v12, %v15_v8  ;;  %v27_v20 = vadd.s32 %v21_v12, %v16_v9  ;;  %v28_v21 = vadd.s32 %v21_v12, %v17_v10  ;;  %v29_v22 = vadd.s32 %v21_v12, %v18_v11  ;;  %p244_p4 = pnand %p243_p3, %p237_p0 }
   0x9   :  { %v33_v23 = vadd.s32 %v32_v13, %v22_v15  ;;  %v34_v24 = vadd.s32 %v32_v13, %v23_v16  ;;  %v35_v25 = vadd.s32 %v32_v13, %v24_v17  ;;  %v36_v26 = vadd.s32 %v32_v13, %v25_v18 }
   0xa   :  { %v37_v27 = vadd.s32 %v32_v13, %v26_v19  ;;  %v38_v28 = vadd.s32 %v32_v13, %v27_v20  ;;  %v39_v29 = vadd.s32 %v32_v13, %v28_v21  ;;  %v40_v30 = vadd.s32 %v32_v13, %v29_v22 }
   0xb   :  { %v41_v31 = vmul.u32 2654435769, %v33_v23  ;;  %v42_v32 = vmul.u32 2654435769, %v34_v24 }
   0xc   :  { %v43_v33 = vmul.u32 2654435769, %v35_v25  ;;  %v44_v34 = vmul.u32 2654435769, %v36_v26 }
   0xd   :  { %v45_v36 = vmul.u32 2654435769, %v37_v27  ;;  %v46_v37 = vmul.u32 2654435769, %v38_v28  ;;  %v49_v38 = vadd.s32 1, %v41_v31  ;;  %v50_v39 = vadd.s32 1, %v42_v32 }
   0xe   :  { %v47_v40 = vmul.u32 2654435769, %v39_v29  ;;  %v48_v41 = vmul.u32 2654435769, %v40_v30  ;;  %v51_v42 = vadd.s32 1, %v43_v33  ;;  %v52_v43 = vadd.s32 1, %v44_v34 }
   0xf   :  { %v53_v44 = vadd.s32 1, %v45_v36  ;;  %v54_v45 = vadd.s32 1, %v46_v37  ;;  %v57_v46 = vshrl.u32 %v49_v38, 16  ;;  %v58_v47 = vshrl.u32 %v50_v39, 16 }
  0x10   :  { %v55_v48 = vadd.s32 1, %v47_v40  ;;  %v56_v49 = vadd.s32 1, %v48_v41  ;;  %v59_v50 = vshrl.u32 %v51_v42, 16  ;;  %v60_v51 = vshrl.u32 %v52_v43, 16 }
  0x11   :  { %v61_v52 = vshrl.u32 %v53_v44, 16  ;;  %v62_v53 = vshrl.u32 %v54_v45, 16  ;;  %v65_v54 = vxor.u32 %v57_v46, %v49_v38  ;;  %v66_v55 = vxor.u32 %v58_v47, %v50_v39 }
  0x12   :  { %v63_v56 = vshrl.u32 %v55_v48, 16  ;;  %v64_v57 = vshrl.u32 %v56_v49, 16  ;;  %v67_v58 = vxor.u32 %v59_v50, %v51_v42  ;;  %v68_v59 = vxor.u32 %v60_v51, %v52_v43 }
  0x13   :  { %v69_v60 = vxor.u32 %v61_v52, %v53_v44  ;;  %v70_v61 = vxor.u32 %v62_v53, %v54_v45  ;;  %v73_v62 = vmul.u32 2146121005, %v65_v54  ;;  %v74_v63 = vmul.u32 2146121005, %v66_v55 }
  0x14   :  { %v71_v0 = vxor.u32 %v63_v56, %v55_v48  ;;  %v72_v1 = vxor.u32 %v64_v57, %v56_v49  ;;  %v75_v2 = vmul.u32 2146121005, %v67_v58  ;;  %v76_v3 = vmul.u32 2146121005, %v68_v59 }
  0x15   :  { %v77_v4 = vmul.u32 2146121005, %v69_v60  ;;  %v78_v5 = vmul.u32 2146121005, %v70_v61  ;;  %v81_v6 = vshrl.u32 %v73_v62, 15  ;;  %v82_v7 = vshrl.u32 %v74_v63, 15 }
  0x16   :  { %v79_v8 = vmul.u32 2146121005, %v71_v0  ;;  %v80_v9 = vmul.u32 2146121005, %v72_v1  ;;  %v83_v10 = vshrl.u32 %v75_v2, 15  ;;  %v84_v11 = vshrl.u32 %v76_v3, 15 }
  0x17   :  { %v85_v12 = vshrl.u32 %v77_v4, 15  ;;  %v86_v13 = vshrl.u32 %v78_v5, 15  ;;  %v89_v14 = vxor.u32 %v81_v6, %v73_v62  ;;  %v90_v15 = vxor.u32 %v82_v7, %v74_v63 }
  0x18   :  { %v87_v16 = vshrl.u32 %v79_v8, 15  ;;  %v88_v17 = vshrl.u32 %v80_v9, 15  ;;  %v91_v18 = vxor.u32 %v83_v10, %v75_v2  ;;  %v92_v19 = vxor.u32 %v84_v11, %v76_v3 }
  0x19   :  { %v93_v20 = vxor.u32 %v85_v12, %v77_v4  ;;  %v94_v21 = vxor.u32 %v86_v13, %v78_v5  ;;  %v97_v22 = vmul.u32 2221713035, %v89_v14  ;;  %v98_v23 = vmul.u32 2221713035, %v90_v15 }
  0x1a   :  { %v95_v24 = vxor.u32 %v87_v16, %v79_v8  ;;  %v96_v25 = vxor.u32 %v88_v17, %v80_v9  ;;  %v99_v26 = vmul.u32 2221713035, %v91_v18  ;;  %v100_v27 = vmul.u32 2221713035, %v92_v19 }
  0x1b   :  { %v101_v28 = vmul.u32 2221713035, %v93_v20  ;;  %v102_v29 = vmul.u32 2221713035, %v94_v21  ;;  %v105_v30 = vshrl.u32 %v97_v22, 16  ;;  %v106_v31 = vshrl.u32 %v98_v23, 16 }
  0x1c   :  { %v103_v32 = vmul.u32 2221713035, %v95_v24  ;;  %v104_v33 = vmul.u32 2221713035, %v96_v25  ;;  %v107_v34 = vshrl.u32 %v99_v26, 16  ;;  %v108_v36 = vshrl.u32 %v100_v27, 16 }
  0x1d   :  { %v109_v37 = vshrl.u32 %v101_v28, 16  ;;  %v110_v38 = vshrl.u32 %v102_v29, 16  ;;  %v113_v39 = vxor.u32 %v105_v30, %v97_v22  ;;  %v114_v40 = vxor.u32 %v106_v31, %v98_v23 }
  0x1e   :  { %v111_v41 = vshrl.u32 %v103_v32, 16  ;;  %v112_v42 = vshrl.u32 %v104_v33, 16  ;;  %v115_v43 = vxor.u32 %v107_v34, %v99_v26  ;;  %v116_v44 = vxor.u32 %v108_v36, %v100_v27 }
  0x1f   :  { %v117_v45 = vxor.u32 %v109_v37, %v101_v28  ;;  %v118_v46 = vxor.u32 %v110_v38, %v102_v29  ;;  %v121_v47 = vshrl.u32 %v113_v39, 9  ;;  %v122_v48 = vshrl.u32 %v114_v40, 9 }
  0x20   :  { %v119_v49 = vxor.u32 %v111_v41, %v103_v32  ;;  %v120_v50 = vxor.u32 %v112_v42, %v104_v33  ;;  %v123_v51 = vshrl.u32 %v115_v43, 9  ;;  %v124_v52 = vshrl.u32 %v116_v44, 9 }
  0x21   :  { %v125_v53 = vshrl.u32 %v117_v45, 9  ;;  %v126_v54 = vshrl.u32 %v118_v46, 9  ;;  %v129_v55 = vor.u32 1065353216, %v121_v47  ;;  %v130_v56 = vor.u32 1065353216, %v122_v48 }
  0x22   :  { %v127_v57 = vshrl.u32 %v119_v49, 9  ;;  %v128_v58 = vshrl.u32 %v120_v50, 9  ;;  %v131_v59 = vor.u32 1065353216, %v123_v51  ;;  %v132_v60 = vor.u32 1065353216, %v124_v52 }
  0x23   :  { %v133_v61 = vor.u32 1065353216, %v125_v53  ;;  %v134_v62 = vor.u32 1065353216, %v126_v54  ;;  %v226_v63 = vadd.f32 -1.0, %v129_v55  ;;  %v227_v0 = vadd.f32 -1.0, %v130_v56 }
  0x24   :  { %v135_v1 = vor.u32 1065353216, %v127_v57  ;;  %v136_v2 = vor.u32 1065353216, %v128_v58  ;;  %v228_v3 = vadd.f32 -1.0, %v131_v59  ;;  %v229_v4 = vadd.f32 -1.0, %v132_v60 }
  0x25   :  { %v230_v5 = vadd.f32 -1.0, %v133_v61  ;;  %v231_v6 = vadd.f32 -1.0, %v134_v62  ;;  %v161_v7 = vcombine.low %v226_v63, %v227_v0 }
  0x26   :  { %v232_v8 = vadd.f32 -1.0, %v135_v1  ;;  %v233_v9 = vadd.f32 -1.0, %v136_v2  ;;  %v162_v10 = vcombine.low %v228_v3, %v229_v4 }
  0x27   :  { %v163_v11 = vcombine.low %v230_v5, %v231_v6  ;;  %v171_v12 = vrot.slane %v161_v7, %v275_v35 }
  0x28   :  { %v164_v13 = vcombine.low %v232_v8, %v233_v9  ;;  %v178_v14 = vrot.slane %v162_v10, %v275_v35 }
  0x29   :  { %v185_v15 = vrot.slane %v163_v11, %v275_v35 }
  0x2a   :  { %v192_v16 = vrot.slane %v164_v13, %v275_v35  ;;  %v193_v17 = vcombine.low %v171_v12, %v178_v14 }
  0x2c   :  { %v194_v18 = vcombine.low %v185_v15, %v192_v16  ;;  %v201_v19 = vrot.slane %v193_v17, %v275_v35 }
  0x2e   :  { %v208_v20 = vrot.slane %v194_v18, %v275_v35 }
  0x30   :  { %v209_v21 = vcombine.low %v201_v19, %v208_v20 }
  0x32   :  { %211 = vst [vmem:[#allocation4] sm:$0xff] %v209_v21 }
  0x33   :  { %247 = shalt.err (!%p244_p4)
}
  0x34   :  { %s248_s13 = scalar_lea.hbm %s296_s1, 128 }
  0x35   :  { %p249_p5 = scmp.ne.s32.totalorder %s296_s1, %s248_s13  ;;  %p252_p6 = scmp.lt.u32.totalorder %s248_s13, %s296_s1 }
  0x37   :  { %p254_p7 = pnand %p252_p6, %p249_p5 }
  0x39   :  { %257 = shalt.err (!%p254_p7)
}
  0x3a   :  { %221 = dma.vmem_to_hbm [thread:$0]  %s219_s9, 128, %s296_s1, [#allocation5]  }
  0x3b   :  { %258 = dma.done.wait [#allocation5], 128  }
  0x3c   :  { %259 = vsyncadd [#allocation5], 4294967168 }
  0x3d   :  { %225 = vsyncpa [#allocation5], 1 }

</bundles_post_ra>
